<compile_context>
chip_gen: v6e
topology: v6e:2x2x1
jax: 0.10.0
libtpu: 0.0.40
codegen_flags: <defaults>
</compile_context>

<pallas_src>
import jax
import jax.numpy as jnp
from jax import lax
from jax.experimental import pallas as pl
from jax.experimental.pallas import tpu as pltpu

IN_FEATURES = 10
OUT_FEATURES = 3
LANE = 128
MAX_TILE_B = 65536        # 64K lanes: double-buffered f32 footprint ~12.6 MB
TARGET_GRID_STEPS = 4     # keep >=2 grid steps so both v7x TCs participate


def _round_up(n, m):
    return ((n + m - 1) // m) * m


def linear_kernel(x_ref, w_ref, b_ref, o_ref):
    # x_ref: (IN, TB)   input tile, batch on lanes
    # w_ref: (OUT, IN)  resident weight (constant index_map)
    # b_ref: (OUT, 1)   resident bias
    # o_ref: (OUT, TB)  lane-dense output tile
    # MXU contraction (vector-extended slot; VALU/XLU stay free). HIGHEST
    # precision keeps full f32 accuracy for the tiny K=10 reduction.
    acc = jnp.dot(w_ref[...], x_ref[...],
                  preferred_element_type=jnp.float32,
                  precision=lax.Precision.HIGHEST)
    o_ref[...] = (acc + b_ref[...]).astype(o_ref.dtype)


@jax.jit
def linear_forward(x, weight, bias):
    """y = x @ weight.T + bias   (torch.nn.Linear(10, 3) semantics).

    x: (B, IN) f32, weight: (OUT, IN) f32, bias: (OUT,) f32 -> (B, OUT) f32.
    """
    B = x.shape[0]
    if B == 0:  # trace-time branch; avoids a zero-size grid
        return jnp.zeros((0, OUT_FEATURES), x.dtype)

    # Lane-dense layout: batch on lanes, features/outputs on sublanes.
    # Under jit this transpose fuses into the pallas_call operand; no pad —
    # the ragged last tile is masked by Pallas (OOB loads padded, OOB stores
    # discarded).
    x_t = x.T                                     # (IN, B)
    bias2d = bias.reshape(OUT_FEATURES, 1)        # (OUT, 1)

    # Tile sizing: aim for >= TARGET_GRID_STEPS grid steps, multiple of 128
    # lanes, capped at MAX_TILE_B.
    tb = max(LANE, min(MAX_TILE_B,
                       _round_up(pl.cdiv(B, TARGET_GRID_STEPS), LANE)))
    grid = (pl.cdiv(B, tb),)

    # Double-buffered VMEM footprint: x tile (10 -> 16 sublanes) + out tile
    # (3 -> 8 sublanes), f32, x2 buffers each = 192 * tb bytes. Give headroom
    # (v5e's default scoped limit is only 16 MiB).
    vmem_bytes = 2 * (16 + 8) * 4 * tb
    vmem_limit = int(min(100 * 2**20, max(32 * 2**20, vmem_bytes + (8 << 20))))

    out_t = pl.pallas_call(
        linear_kernel,
        out_shape=jax.ShapeDtypeStruct((OUT_FEATURES, B), x.dtype),
        grid=grid,
        in_specs=[
            pl.BlockSpec((IN_FEATURES, tb), lambda i: (0, i)),
            pl.BlockSpec((OUT_FEATURES, IN_FEATURES), lambda i: (0, 0)),
            pl.BlockSpec((OUT_FEATURES, 1), lambda i: (0, 0)),
        ],
        out_specs=pl.BlockSpec((OUT_FEATURES, tb), lambda i: (0, i)),
        compiler_params=pltpu.CompilerParams(
            dimension_semantics=("parallel",),
            vmem_limit_bytes=vmem_limit),
        cost_estimate=pl.CostEstimate(
            flops=2 * B * IN_FEATURES * OUT_FEATURES,
            transcendentals=0,
            bytes_accessed=(B * IN_FEATURES + B * OUT_FEATURES
                            + OUT_FEATURES * IN_FEATURES + OUT_FEATURES) * 4),
    )(x_t, weight, bias2d)

    # (B, OUT) — transpose fuses into the jitted epilogue.
    return out_t.T


if __name__ == "__main__":
    key = jax.random.PRNGKey(0)
    k_x1, k_x2, k_x3, k_w, k_b = jax.random.split(key, 5)

    # Deterministic parameter init (mimics torch.nn.Linear uniform init range).
    bound = 1.0 / (IN_FEATURES ** 0.5)
    weight = jax.random.uniform(
        k_w, (OUT_FEATURES, IN_FEATURES), jnp.float32, -bound, bound)
    bias = jax.random.uniform(
        k_b, (OUT_FEATURES,), jnp.float32, -bound, bound)

    ok = True

    # (a) Lane-aligned batch: 2 grid steps, exercises pipeline + parallel axis.
    x1 = jax.random.normal(k_x1, (256, IN_FEATURES), jnp.float32)
    out1 = jax.block_until_ready(linear_forward(x1, weight, bias))
    ref1 = x1 @ weight.T + bias
    ok &= out1.shape == (256, OUT_FEATURES)
    ok &= bool(jnp.allclose(out1, ref1, atol=1e-4, rtol=1e-4))

    # (b) Ragged batch: masked last tile, no host-side pad/slice.
    x2 = jax.random.normal(k_x2, (200, IN_FEATURES), jnp.float32)
    out2 = jax.block_until_ready(linear_forward(x2, weight, bias))
    ref2 = x2 @ weight.T + bias
    ok &= out2.shape == (200, OUT_FEATURES)
    ok &= bool(jnp.allclose(out2, ref2, atol=1e-4, rtol=1e-4))

    # (c) Tiny batch (B=2): single partial tile.
    x3 = jax.random.normal(k_x3, (2, IN_FEATURES), jnp.float32)
    out3 = jax.block_until_ready(linear_forward(x3, weight, bias))
    ref3 = x3 @ weight.T + bias
    ok &= out3.shape == (2, OUT_FEATURES)
    ok &= bool(jnp.allclose(out3, ref3, atol=1e-4, rtol=1e-4))

    assert ok
    print("KERNEL_OK")
</pallas_src>

<mosaic_0001>
module attributes {stable_mosaic.version = 11 : i64} {
  func.func @linear_kernel(%arg0: i32, %arg1: memref<10x128xf32, #tpu.memory_space<vmem>>, %arg2: memref<3x10xf32, #tpu.memory_space<vmem>>, %arg3: memref<3x1xf32, #tpu.memory_space<vmem>>, %arg4: memref<3x128xf32, #tpu.memory_space<vmem>>) attributes {dimension_semantics = [#tpu.dimension_semantics<parallel>], iteration_bounds = array<i64: 2>, scalar_prefetch = 0 : i64, scratch_operands = 0 : i64, tpu.core_type = #tpu.core_type<tc>, window_params = [{transform_indices = @transform_0, window_bounds = array<i64: 10, 128>}, {pipeline_mode = #tpu.pipeline_mode<synchronous>, transform_indices = @transform_1, window_bounds = array<i64: 3, 10>}, {pipeline_mode = #tpu.pipeline_mode<synchronous>, transform_indices = @transform_2, window_bounds = array<i64: 3, 1>}, {transform_indices = @transform_3, window_bounds = array<i64: 3, 128>}]} {
    %c0 = arith.constant 0 : index
    %c0_0 = arith.constant 0 : index
    %0 = vector.load %arg2[%c0, %c0_0] : memref<3x10xf32, #tpu.memory_space<vmem>>, vector<3x10xf32>
    %c0_1 = arith.constant 0 : index
    %c0_2 = arith.constant 0 : index
    %1 = vector.load %arg1[%c0_1, %c0_2] : memref<10x128xf32, #tpu.memory_space<vmem>>, vector<10x128xf32>
    %cst = arith.constant dense<0.000000e+00> : vector<3x128xf32>
    %2 = tpu.matmul %0, %1, %cst {dimension_numbers = #tpu.dot_dimension_numbers<[1], [0], [0], [1], [0, 0, 1, 1], [], []>, precision = #tpu.contract_precision<fp32>} : vector<3x10xf32>, vector<10x128xf32>, vector<3x128xf32> -> vector<3x128xf32>
    %c0_3 = arith.constant 0 : index
    %c0_4 = arith.constant 0 : index
    %3 = vector.load %arg3[%c0_3, %c0_4] : memref<3x1xf32, #tpu.memory_space<vmem>>, vector<3x1xf32>
    %4 = vector.broadcast %3 : vector<3x1xf32> to vector<3x128xf32>
    %5 = arith.addf %2, %4 : vector<3x128xf32>
    %c0_5 = arith.constant 0 : index
    %c0_6 = arith.constant 0 : index
    %6 = vector.load %arg4[%c0_5, %c0_6] : memref<3x128xf32, #tpu.memory_space<vmem>>, vector<3x128xf32>
    tpu.vector_store %arg4[%c0_5, %c0_6], %5 {strides = array<i32>} : memref<3x128xf32, #tpu.memory_space<vmem>>, vector<3x128xf32>,
    return
  }
  func.func @transform_0(%arg0: i32) -> (i32, i32) {
    %c0_i32 = arith.constant 0 : i32
    %c0_i32_0 = arith.constant 0 : i32
    return %c0_i32, %arg0 : i32, i32
  }
  func.func @transform_1(%arg0: i32) -> (i32, i32) {
    %c0_i32 = arith.constant 0 : i32
    %c0_i32_0 = arith.constant 0 : i32
    %c0_i32_1 = arith.constant 0 : i32
    return %c0_i32, %c0_i32_0 : i32, i32
  }
  func.func @transform_2(%arg0: i32) -> (i32, i32) {
    %c0_i32 = arith.constant 0 : i32
    %c0_i32_0 = arith.constant 0 : i32
    %c0_i32_1 = arith.constant 0 : i32
    return %c0_i32, %c0_i32_0 : i32, i32
  }
  func.func @transform_3(%arg0: i32) -> (i32, i32) {
    %c0_i32 = arith.constant 0 : i32
    %c0_i32_0 = arith.constant 0 : i32
    return %c0_i32, %arg0 : i32, i32
  }
}

</mosaic_0001>

<bundles_post_ra>
// kernel: linear_forward.1
= control target key start
LH: loop header
LB: loop body
LE: loop exit
PB: predicated region body
PF: predicated region fallthrough
CT: control target
= control target key end

     0   :  { %8 = vsyncpa [#allocation3], 0  ;;  %s1157_s0 = inlined_call_operand.hbm [shape: f32[10,256], index: 0, kind: input, shape index: {}]   ;;  %s1158_s1 = inlined_call_operand.vmem [shape: f32[3,10], index: 1, kind: input, shape index: {}]   ;;  %s1159_s2 = inlined_call_operand.vmem [shape: f32[3,1], index: 2, kind: input, shape index: {}]   ;;  %s1160_s3 = inlined_call_operand.hbm [shape: f32[3,256], index: 3, kind: output, shape index: {}]  }
   0x1   :  { %10 = vsyncpa [#allocation3 + $0x1], 0 }
   0x2   :  { %11 = vsyncpa [#allocation4], 0 }
   0x3   :  { %13 = vsyncpa [#allocation4 + $0x1], 0  ;;  %s996_s12 = smov 0   ;;  %s998_s13 = smov 0  }
   0x4   :  { %s1000_s14 = smov 0   ;;  %s1002_s15 = smov 0  }
   0x5 LB: > { %s1017_s16 = sadd.s32 4294967295, %s966_s15   ;;  %s749_s17 = sadd.s32 4294967294, %s966_s15   ;;  %s966_s15 = sphi %s1002_s15, %s1176_s15   ;;  %s962_s14 = sphi %s1000_s14, %s1175_s14   ;;  %s958_s13 = sphi %s998_s13, %s1174_s13   ;;  %s954_s12 = sphi %s996_s12, %s1173_s12  }
   0x6   : > { %s1021_s18 = sadd.s32 1, %s966_s15   ;;  %s26_s19 = sadd.s32 1, %s962_s14 }
   0x7   : > { %s23_s20 = ssub.s32 %s966_s15, %s1021_s18  ;;  %p33_p0 = scmp.ne.s32.totalorder %s962_s14, %s958_s13 }
   0x8   : > { %p24_p1 = scmp.eq.s32.totalorder %s23_s20, 0  ;;  %p34_p2 = scmp.eq.s32.totalorder %s966_s15, 0 }
   0x9   : > { %p39_p3 = scmp.ne.s32.totalorder %s958_s13, %s954_s12  ;;  %p40_p4 = scmp.eq.s32.totalorder %s1017_s16, 0 }
   0xa   : > { %s1033_s21 = scalar_select %p24_p1, %s962_s14, %s26_s19  }
   0xb   : > { %p1035_p5 = por %p34_p2, %p33_p0  ;;  %p1039_p6 = por %p40_p4, %p39_p3 }
   0xc   : > { %p105_p7 = scmp.eq.s32.totalorder %s1017_s16, 1  ;;  %p111_p8 = scmp.eq.s32.totalorder %s749_s17, 1 }
   0xd   : > { %s1164_s23 = scalar_select %p1039_p6, 1, 0 }
   0xe   : > { %p833_p10 = scmp.lt.s32.totalorder %s966_s15, 2  ;;  %p1046_p11 = por %p105_p7, %p33_p0 }
   0xf   : > { %p1050_p12 = por %p111_p8, %p39_p3  ;;  %s137_s26 = sand.u32 1, %s962_s14  }
  0x10   : > { %s1165_s24 = scalar_select %p1046_p11, 1, 0 }
  0x11   : > { %s1166_s25 = scalar_select %p1050_p12, 1, 0 }
  0x12   : > { %s753_s27 = sshll.u32 %s966_s15, 7  ;;  %s752_s28 = sshll.u32 %s137_s26, 4 }
  0x13   : > { %s1059_s4 = scalar_lea.hbm %s1157_s0, %s753_s27  ;;  %s141_s5 = scalar_lea.vmem [#allocation2], %s752_s28 }
  0x14   : > { %s147_s6 = sshll.u32 %s141_s5, 4  ;;  %p1063_p13 = pnand %p833_p10, %p1035_p5  ;;  %s1067_s6 = int_to_ptr.vmem [resolvable:$true] %s147_s6 }
  0x15   : > { %s1070_s8 = scalar_lea.sflag [#allocation3], %s137_s26  ;;  %s874_s9 = scalar_lea.hbm %s1059_s4, 256 }
  0x16   : > { %p875_p1 = scmp.ne.s32.totalorder %s1059_s4, %s874_s9  ;;  %p876_p2 = pneg %p1063_p13 }
  0x17   : > { %s879_s17 = scalar_lea.hbm %s1157_s0, 512  ;;  %p880_p5 = scmp.lt.s32.totalorder %s1059_s4, %s1157_s0 }
  0x18   : > { %p877_p3 = pnand %p876_p2, %p875_p1  ;;  %p881_p7 = scmp.lt.s32.totalorder %s879_s17, %s874_s9 }
  0x1a   : > { %p878_p4 = pneg %p877_p3  ;;  %p882_p8 = por %p881_p7, %p880_p5 }
  0x1c   : > { %p883_p10 = pnand %p882_p8, %p878_p4 }
  0x1e   : > { %886 = shalt.err (!%p883_p10)
}
  0x1f   : > { %s887_s22 = scalar_lea.vmem %s1067_s6, 256  ;;  %s968_s26 = smov [#allocation2]  }
  0x20   : > { %p888_p9 = scmp.ne.s32.totalorder %s1067_s6, %s887_s22  ;;  %s892_s27 = sshll.u32 %s968_s26, 4  ;;  %s893_s27 = int_to_ptr.vmem [resolvable:$false] %s892_s27 }
  0x21   : > { %s894_s28 = scalar_lea.vmem %s893_s27, 512  ;;  %p895_p3 = scmp.lt.s32.totalorder %s1067_s6, %s893_s27 }
  0x22   : > { %p890_p0 = pnand %p888_p9, %p876_p2  ;;  %p896_p12 = scmp.lt.s32.totalorder %s894_s28, %s887_s22 }
  0x24   : > { %p891_p1 = pneg %p890_p0  ;;  %p897_p11 = por %p896_p12, %p895_p3 }
  0x26   : > { %p898_p6 = pnand %p897_p11, %p891_p1 }
  0x28   : > { %901 = shalt.err (!%p898_p6)
}
  0x29   : > { %s969_s29 = smov 256   ;;  %s970_s30 = smov 128  }
  0x2a   : > { %s971_s5 = smov 8   ;;  %p155_p9 = scmp.lt.s32.totalorder %s966_s15, 3 }
  0x2b   : > { %828 = dma.hbm_to_vmem [thread:$0]  (!%p1063_p13), %s1059_s4, 256, %s1067_s6, %s1070_s8, %s969_s29, %s970_s30, %s971_s5  }
  0x2c   : > { %p1168_p0 = scmp.ge.s32.totalorder %s966_s15, 1 }
  0x2e   : > { %p156_p2 = pnand %p1168_p0, %p155_p9 }
  0x2f   : > { %s1095_s9 = sand.u32 (!%p156_p2), 1, %s958_s13   ;;  %p1169_p6 = scmp.ne.s32.totalorder (!%p156_p2), %s1164_s23, 0 }
  0x30   : > { %159 = sbr.rel (%p156_p2) target bundleno = 289 (0x121), region = 32  ;;  %s755_s10 = sshll.u32 (!%p156_p2), %s1095_s9, 4 }
  0x31   : > { %s162_s11 = scalar_lea.sflag (!%p156_p2), [#allocation3], %s1095_s9  ;;  %s165_s17 = scalar_lea.vmem (!%p156_p2), [#allocation2], %s755_s10 }
  0x35   : > { %945 = dma.done.wait (%p1169_p6), %s162_s11, 256  }
  0x36   : > { %947 = vsyncadd (%p1169_p6), %s162_s11, 4294967040  ;;  %v972_v0 = vmov 0.0   ;;  %vm973_vm0 = vmmov 0   ;;  %v974_v1 = vmov 0   ;;  %vm201_vm1 = vcmask 1041408   ;;  %v189_v3 = vld [vmem:[%s165_s17] sm:$0xff] }
  0x37   : > { %779 = vmatprep.subr.mxu0 %v972_v0  ;;  %783 = vmatprep.mubr.msk.f32.mxu0 %vm973_vm0, %v972_v0  ;;  %vm197_vm2 = vcmask 80896   ;;  %v190_v2 = vld [vmem:[%s165_s17 + $0x8] sm:$0x3]  ;;  %v188_v4 = vld [vmem:[%s1158_s1] sm:$0x7]  ;;  %v237_v6 = vand.u32 4294901760, %v189_v3 }
  0x38   : > { %786 = vmatprep.subr.mxu1 %v972_v0  ;;  %790 = vmatprep.mubr.msk.f32.mxu1 %vm973_vm0, %v972_v0  ;;  %v203_v5 = vsel %vm201_vm1, %v190_v2, 0  ;;  %v199_v7 = vsel %vm197_vm2, %v188_v4, 0  ;;  %v191_v8 = vld [vmem:[%s1159_s2] sm:$0x7]  ;;  %s756_s8 = sshll.u32 %s1095_s9, 2  ;;  %s758_s19 = sshll.u32 %s1017_s16, 6 }
  0x39   : > { %873 = vset.pattern.permute.xlu0 %v974_v1  ;;  %v234_v9 = vand.u32 4294901760, %v203_v5  ;;  %v272_v10 = vand.u32 4294901760, %v199_v7  ;;  %v319_v11 = vsub.f32 %v189_v3, %v237_v6  ;;  %s187_s20 = scalar_lea.vmem [#allocation5], %s756_s8  ;;  %s1120_s28 = scalar_lea.hbm %s1160_s3, %s758_s19 }
  0x3a   : > { %194 = vperm.xlu0 %873, %v191_v8   ;;  %s679_s22 = sshll.u32 %s187_s20, 4  ;;  %s666_s29 = scalar_lea.sflag [#allocation4], %s1095_s9  ;;  %s680_s22 = int_to_ptr.vmem [resolvable:$true] %s679_s22 }
  0x3b   : > { %780 = vmatpush3.msra.mxu0 %v234_v9  ;;  %v273_v12 = vsub.f32 %v199_v7, %v272_v10  ;;  %v312_v13 = vsub.f32 %v203_v5, %v234_v9  ;;  %v320_v14 = vand.u32 4294901760, %v319_v11  ;;  %s902_s30 = scalar_lea.vmem %s680_s22, 64  ;;  %p1170_p12 = scmp.ne.s32.totalorder %s1165_s24, 0 }
  0x3c   : > { %781 = vmatprep.subr.mxu0 %v972_v0  ;;  %p903_p11 = scmp.ne.s32.totalorder %s680_s22, %s902_s30  ;;  %s975_s16 = smov [#allocation5]  }
  0x3d   : > { %782 = vmatpush3.msra.mxu0 %v237_v6  ;;  %v274_v15 = vand.u32 4294901760, %v273_v12  ;;  %v313_v16 = vand.u32 4294901760, %v312_v13  ;;  %v321_v17 = vsub.f32 %v319_v11, %v320_v14  ;;  %s906_s5 = sshll.u32 %s975_s16, 4  ;;  %s907_s5 = int_to_ptr.vmem [resolvable:$false] %s906_s5 }
  0x3e   : > { %793 = vmatprep.subr.mxu0 %v972_v0  ;;  %p904_p13 = pnand %p903_p11, %p1170_p12  ;;  %s908_s10 = scalar_lea.vmem %s907_s5, 128 }
  0x3f   : > { %v275_v18 = vsub.f32 %v273_v12, %v274_v15  ;;  %v314_v19 = vsub.f32 %v312_v13, %v313_v16  ;;  %v322_v22 = vand.u32 4294901760, %v321_v17  ;;  %p909_p5 = scmp.lt.s32.totalorder %s680_s22, %s907_s5  ;;  %p910_p7 = scmp.lt.s32.totalorder %s908_s10, %s902_s30 }
  0x40   : > { %p905_p4 = pneg %p904_p13 }
  0x41   : > { %v276_v20 = vand.u32 4294901760, %v275_v18  ;;  %v315_v21 = vand.u32 4294901760, %v314_v19  ;;  %p911_p8 = por %p910_p7, %p909_p5 }
  0x43   : > { %784 = vmatmul.mubr.f32.vlgmr.msra.gmra.mxu0 %v276_v20  ;;  %787 = vmatpush3.msra.mxu1 %v315_v21  ;;  %p912_p10 = pnand %p911_p8, %p905_p4 }
  0x44   : > { %788 = vmatprep.subr.mxu1 %v972_v0  ;;  %794 = vmatpush3.msra.mxu0 %v312_v13 }
  0x45   : > { %789 = vmatpush3.msra.mxu1 %v322_v22  ;;  %795 = vmatprep.subr.mxu0 %v972_v0 }
  0x46   : > { %791 = vmatmul.mubr.f32.vlgmr.msra.gmra.mxu1 %v272_v10  ;;  %796 = vmatpush3.msra.mxu0 %v319_v11 }
  0x47   : > { %797 = vmatprep.mubr.msk.f32.mxu0 %vm973_vm0, %v972_v0  ;;  %800 = vmatprep.subr.mxu1 %v972_v0 }
  0x48   : > { %798 = vmatmul.mubr.f32.vlgmr.msra.gmra.mxu0 %v273_v12  ;;  %801 = vmatpush3.msra.mxu1 %v234_v9 }
  0x49   : > { %807 = vmatprep.subr.mxu0 %v972_v0  ;;  %802 = vmatprep.subr.mxu1 %v972_v0 }
  0x4a   : > { %808 = vmatpush3.msra.mxu0 %v313_v16  ;;  %803 = vmatpush3.msra.mxu1 %v237_v6 }
  0x4b   : > { %804 = vmatprep.mubr.msk.f32.mxu1 %vm973_vm0, %v972_v0  ;;  %809 = vmatprep.subr.mxu0 %v972_v0 }
  0x4c   : > { %805 = vmatmul.mubr.f32.vlgmr.msra.gmra.mxu1 %v274_v15  ;;  %810 = vmatpush3.msra.mxu0 %v320_v14 }
  0x4d   : > { %811 = vmatprep.mubr.msk.f32.mxu0 %vm973_vm0, %v972_v0  ;;  %814 = vmatprep.subr.mxu1 %v972_v0 }
  0x4e   : > { %812 = vmatmul.mubr.f32.vlgmr.msra.gmra.mxu0 %v272_v10  ;;  %815 = vmatpush3.msra.mxu1 %v234_v9 }
  0x4f   : > { %816 = vmatprep.subr.mxu1 %v972_v0  ;;  %818 = vmatprep.mubr.msk.f32.mxu1 %vm973_vm0, %v972_v0 }
  0x50   : > { %817 = vmatpush3.msra.mxu1 %v237_v6 }
  0x51   : > { %819 = vmatmul.mubr.f32.vlgmr.msra.gmra.mxu1 %v272_v10 }
  0xb5   : > { %v195_v23 = vpop.permute.xlu0 %194 }
 0x103   : > { %v278_v24 = vpop.f32.mrf.mxu0 }
 0x104   : > { %v279_v25 = vadd.f32 %v278_v24, %v195_v23 }
 0x105   : > { %v785_v26 = vpop.f32.mrf.mxu0 }
 0x106   : > { %v359_v27 = vpop.f32.mrf.mxu1 }
 0x107   : > { %v360_v28 = vadd.f32 %v359_v27, %v279_v25 }
 0x108   : > { %v435_v29 = vpop.f32.mrf.mxu0  ;;  %v792_v30 = vpop.f32.mrf.mxu1 }
 0x109   : > { %v436_v31 = vadd.f32 %v435_v29, %v360_v28 }
 0x10a   : > { %v799_v32 = vpop.f32.mrf.mxu0 }
 0x10c   : > { %v510_v33 = vpop.f32.mrf.mxu1 }
 0x10d   : > { %v511_v34 = vadd.f32 %v510_v33, %v436_v31 }
 0x10e   : > { %v587_v35 = vpop.f32.mrf.mxu0  ;;  %v806_v36 = vpop.f32.mrf.mxu1 }
 0x10f   : > { %v588_v37 = vadd.f32 %v587_v35, %v511_v34 }
 0x110   : > { %v813_v38 = vpop.f32.mrf.mxu0 }
 0x111   : > { %v660_v39 = vpop.f32.mrf.mxu1 }
 0x112   : > { %v661_v40 = vadd.f32 %v660_v39, %v588_v37 }
 0x113   : > { %v820_v41 = vpop.f32.mrf.mxu1 }
 0x114   : > { %664 = vst [vmem:[%s187_s20] sm:$0x7] %v661_v40 }
 0x115   : > { %915 = shalt.err (!%p912_p10)
}
 0x116   : > { %s916_s11 = scalar_lea.hbm %s1120_s28, 64  ;;  %s920_s4 = scalar_lea.hbm %s1160_s3, 128 }
 0x117   : > { %p917_p1 = scmp.ne.s32.totalorder %s1120_s28, %s916_s11  ;;  %p921_p0 = scmp.lt.s32.totalorder %s1120_s28, %s1160_s3 }
 0x118   : > { %p922_p2 = scmp.lt.s32.totalorder %s920_s4, %s916_s11 }
 0x119   : > { %p918_p3 = pnand %p917_p1, %p1170_p12 }
 0x11a   : > { %p923_p6 = por %p922_p2, %p921_p0 }
 0x11b   : > { %p919_p9 = pneg %p918_p3 }
 0x11d   : > { %p924_p11 = pnand %p923_p6, %p919_p9 }
 0x11f   : > { %927 = shalt.err (!%p924_p11)
}
 0x120   : > { %823 = dma.vmem_to_hbm [thread:$0]  (%p1170_p12), %s680_s22, 64, %s1120_s28, %s666_s29  }
 0x121 PF: > { %s691_s7 = sand.u32 1, %s954_s12   ;;  %p1171_p13 = scmp.ne.s32.totalorder %s1166_s25, 0 }
 0x122   : > { %p1172_p4 = scmp.ge.s32.totalorder %s966_s15, 2  ;;  %s692_s8 = scalar_lea.sflag [#allocation4], %s691_s7 }
 0x124   : > { %p830_p5 = pnand %p1172_p4, %p1171_p13 }
 0x126   : > { %p831_p7 = pneg %p830_p5 }
 0x128   : > { %949 = dma.done.wait (%p831_p7), %s692_s8, 64  }
 0x129   : > { %951 = vsyncadd (%p831_p7), %s692_s8, 4294967232  ;;  %p16_p8 = scmp.ge.s32.totalorder %s1021_s18, 4   ;;  %s1173_s12 = smov %s958_s13 }
 0x12a   : > { %s1174_s13 = smov %s962_s14  ;;  %s1175_s14 = smov %s1033_s21 }
 0x12b   : > { %s1176_s15 = smov %s1021_s18  ;;  %18 = sbr.rel (!%p16_p8) target bundleno = 5 (0x5), region = 77 }
 0x130   :  { %697 = vsyncpa [#allocation3], 1 }
 0x131   :  { %699 = vsyncpa [#allocation3 + $0x1], 1 }
 0x132   :  { %700 = vsyncpa [#allocation4], 1 }
 0x133   :  { %702 = vsyncpa [#allocation4 + $0x1], 1 }

</bundles_post_ra>
